<compile_context>
chip_gen: v6e
topology: v6e:2x2x1
jax: 0.10.0
libtpu: 0.0.40
codegen_flags: <defaults>
</compile_context>

<pallas_src>
import functools

import jax
import jax.numpy as jnp
from jax.experimental import pallas as pl
from jax.experimental.pallas import tpu as pltpu


def _device_kind():
    try:
        return jax.devices()[0].device_kind.lower()
    except Exception:
        return ""


def _is_v7x(kind: str) -> bool:
    # Matches "tpu7x" / "tpu v7x" style device kinds.
    return "7" in kind


def _pick_tb(batch, row_elems, *, block_budget_bytes, num_parallel_cores):
    """Rows per block: whole batch if it fits the per-block budget, else a
    multiple-of-8 cap.  On multi-TensorCore chips (v7x) additionally force
    >= num_parallel_cores grid blocks for batch >= 16 so the "parallel" grid
    axis can shard across cores."""
    cap = max(8, (block_budget_bytes // (row_elems * 4)) // 8 * 8)
    if num_parallel_cores > 1 and batch >= 16:
        per_core = -(-batch // num_parallel_cores)      # cdiv
        per_core = ((per_core + 7) // 8) * 8            # round up to 8 rows
        cap = min(cap, per_core)
    return batch if batch <= cap else cap


def _rsoftmax_kernel(x_ref, o_ref, *, radix, cardinality, rest):
    # Block (TB, C), C = cardinality*radix*rest.  Input flat order (c, r, t);
    # output flat order (PyTorch .transpose(1,2).reshape(B,-1)) is radix-major
    # (r, c, t).
    kl = cardinality * rest  # output slab width per radix index

    # Regroup (c, r, t) -> per-radix slabs laid out (c, t), width kl.  Static
    # ref slices gather the cardinality pieces; one lane-concat per slab.  All
    # subsequent VPU/EUP work and every store are kl-wide instead of rest-wide.
    def slab(r):
        parts = [
            x_ref[:, c * radix * rest + r * rest: c * radix * rest + (r + 1) * rest]
            for c in range(cardinality)
        ]
        y = parts[0] if cardinality == 1 else jnp.concatenate(parts, axis=-1)
        return y.astype(jnp.float32)

    ys = [slab(r) for r in range(radix)]

    # Numerically stable softmax across the radix group, unrolled elementwise.
    m = ys[0]
    for r in range(1, radix):
        m = jnp.maximum(m, ys[r])
    es = [jnp.exp(y - m) for y in ys]
    den = es[0]
    for r in range(1, radix):
        den = den + es[r]
    inv = pl.reciprocal(den, approx=False)  # exact: holds the 1e-5 tolerance

    # One wide store per radix index (lane-dense / unmasked when kl % 128 == 0).
    for r in range(radix):
        o_ref[:, r * kl:(r + 1) * kl] = (es[r] * inv).astype(o_ref.dtype)


def _sigmoid_kernel(x_ref, o_ref):
    x = x_ref[...].astype(jnp.float32)
    # Numerically stable sigmoid: exp of -|x| only.
    z = jnp.exp(-jnp.abs(x))
    inv = pl.reciprocal(1.0 + z, approx=False)
    o_ref[...] = jnp.where(x >= 0, inv, z * inv).astype(o_ref.dtype)


def rsoftmax(x, radix, cardinality):
    """JAX/Pallas equivalent of rSoftMax.forward."""
    batch = x.shape[0]
    flat = x.reshape(batch, -1)                  # free reshape, no extra HBM pass
    total = flat.shape[1]

    kind = _device_kind()
    v7x = _is_v7x(kind)
    block_budget = (2 << 20) if v7x else (8 << 20)   # v7x VMEM is 64 MiB physical
    num_cores = 2 if v7x else 1                      # v7x has 2 TCs per chip

    tb = _pick_tb(batch, total, block_budget_bytes=block_budget,
                  num_parallel_cores=num_cores)
    grid = (pl.cdiv(batch, tb),)

    # in + out blocks, each double-buffered, f32, plus headroom; clamp per
    # generation (v7x: 64 MiB physical / 32 MiB default scoped VMEM).
    block_bytes = tb * total * 4
    vmem_cap = (40 << 20) if v7x else (96 << 20)
    vmem_limit = int(min(vmem_cap, max(16 << 20, 4 * block_bytes + (4 << 20))))

    itemsize = jnp.dtype(x.dtype).itemsize
    cost = pl.CostEstimate(
        flops=5 * batch * total,
        transcendentals=batch * total,
        bytes_accessed=2 * batch * total * itemsize,
    )

    common = dict(
        grid=grid,
        in_specs=[pl.BlockSpec((tb, total), lambda i: (i, 0))],
        out_specs=pl.BlockSpec((tb, total), lambda i: (i, 0)),
        out_shape=jax.ShapeDtypeStruct((batch, total), x.dtype),
        compiler_params=pltpu.CompilerParams(
            dimension_semantics=("parallel",),
            vmem_limit_bytes=vmem_limit,
        ),
        cost_estimate=cost,
    )

    if radix > 1:
        rest = total // (cardinality * radix)
        kernel = functools.partial(
            _rsoftmax_kernel, radix=radix, cardinality=cardinality, rest=rest)
        # Output is already flattened radix-major, matching reshape(batch, -1).
        return pl.pallas_call(kernel, **common)(flat)

    out = pl.pallas_call(_sigmoid_kernel, **common)(flat)
    return out.reshape(x.shape)  # sigmoid preserves the original shape


def _reference(x, radix, cardinality):
    batch = x.shape[0]
    if radix > 1:
        y = x.reshape(batch, cardinality, radix, -1)
        y = jnp.transpose(y, (0, 2, 1, 3))
        y = jax.nn.softmax(y, axis=1)
        return y.reshape(batch, -1)
    return jax.nn.sigmoid(x)


if __name__ == "__main__":
    key = jax.random.PRNGKey(0)

    # Config 1: radix=2, cardinality=4, B=2, rest=32 -> C=256 (kl=128, aligned).
    radix, cardinality, batch, rest = 2, 4, 2, 32
    C = cardinality * radix * rest
    x = jax.random.normal(key, (batch, C, 1, 1, 1), dtype=jnp.float32)

    out = jax.block_until_ready(rsoftmax(x, radix, cardinality))
    ref = _reference(x, radix, cardinality)
    assert out.shape == (batch, C)
    assert jnp.allclose(out, ref, atol=1e-5, rtol=1e-5)

    # Config 2: typical ResNeSt setting cardinality=1, radix=2, larger batch.
    k2 = jax.random.PRNGKey(1)
    x2 = jax.random.normal(k2, (16, 128, 1, 1, 1), dtype=jnp.float32)
    out2 = jax.block_until_ready(rsoftmax(x2, 2, 1))
    ref2 = _reference(x2, 2, 1)
    assert out2.shape == (16, 128)
    assert jnp.allclose(out2, ref2, atol=1e-5, rtol=1e-5)

    # Config 3: bigger batch (exercises multi-block grid on v7x), card=2.
    k3 = jax.random.PRNGKey(2)
    x3 = jax.random.normal(k3, (32, 128, 1, 1, 1), dtype=jnp.float32)
    out3 = jax.block_until_ready(rsoftmax(x3, 2, 2))
    ref3 = _reference(x3, 2, 2)
    assert out3.shape == (32, 128)
    assert jnp.allclose(out3, ref3, atol=1e-5, rtol=1e-5)

    # radix == 1 (sigmoid) branch.
    out_sig = jax.block_until_ready(rsoftmax(x, 1, cardinality))
    ref_sig = _reference(x, 1, cardinality)
    assert out_sig.shape == x.shape
    assert jnp.allclose(out_sig, ref_sig, atol=1e-5, rtol=1e-5)

    print("KERNEL_OK")
</pallas_src>

<mosaic_0001>
module attributes {stable_mosaic.version = 11 : i64} {
  func.func @_rsoftmax_kernel(%arg0: i32, %arg1: memref<2x256xf32, #tpu.memory_space<vmem>>, %arg2: memref<2x256xf32, #tpu.memory_space<vmem>>) attributes {dimension_semantics = [#tpu.dimension_semantics<parallel>], iteration_bounds = array<i64: 1>, scalar_prefetch = 0 : i64, scratch_operands = 0 : i64, tpu.core_type = #tpu.core_type<tc>, window_params = [{transform_indices = @transform_0, window_bounds = array<i64: 2, 256>}, {transform_indices = @transform_1, window_bounds = array<i64: 2, 256>}]} {
    %c0 = arith.constant 0 : index
    %c0_0 = arith.constant 0 : index
    %0 = vector.load %arg1[%c0, %c0_0] : memref<2x256xf32, #tpu.memory_space<vmem>>, vector<2x32xf32>
    %c0_1 = arith.constant 0 : index
    %c64 = arith.constant 64 : index
    %1 = vector.load %arg1[%c0_1, %c64] : memref<2x256xf32, #tpu.memory_space<vmem>>, vector<2x32xf32>
    %c0_2 = arith.constant 0 : index
    %c128 = arith.constant 128 : index
    %2 = vector.load %arg1[%c0_2, %c128] : memref<2x256xf32, #tpu.memory_space<vmem>>, vector<2x32xf32>
    %c0_3 = arith.constant 0 : index
    %c192 = arith.constant 192 : index
    %3 = vector.load %arg1[%c0_3, %c192] : memref<2x256xf32, #tpu.memory_space<vmem>>, vector<2x32xf32>
    %4 = tpu.concatenate %0, %1, %2, %3 in 1 : vector<2x32xf32>, vector<2x32xf32>, vector<2x32xf32>, vector<2x32xf32> -> vector<2x128xf32>
    %c0_4 = arith.constant 0 : index
    %c32 = arith.constant 32 : index
    %5 = vector.load %arg1[%c0_4, %c32] : memref<2x256xf32, #tpu.memory_space<vmem>>, vector<2x32xf32>
    %c0_5 = arith.constant 0 : index
    %c96 = arith.constant 96 : index
    %6 = vector.load %arg1[%c0_5, %c96] : memref<2x256xf32, #tpu.memory_space<vmem>>, vector<2x32xf32>
    %c0_6 = arith.constant 0 : index
    %c160 = arith.constant 160 : index
    %7 = vector.load %arg1[%c0_6, %c160] : memref<2x256xf32, #tpu.memory_space<vmem>>, vector<2x32xf32>
    %c0_7 = arith.constant 0 : index
    %c224 = arith.constant 224 : index
    %8 = vector.load %arg1[%c0_7, %c224] : memref<2x256xf32, #tpu.memory_space<vmem>>, vector<2x32xf32>
    %9 = tpu.concatenate %5, %6, %7, %8 in 1 : vector<2x32xf32>, vector<2x32xf32>, vector<2x32xf32>, vector<2x32xf32> -> vector<2x128xf32>
    %10 = arith.maximumf %4, %9 : vector<2x128xf32>
    %11 = arith.subf %4, %10 : vector<2x128xf32>
    %12 = math.exp %11 : vector<2x128xf32>
    %13 = arith.subf %9, %10 : vector<2x128xf32>
    %14 = math.exp %13 : vector<2x128xf32>
    %15 = arith.addf %12, %14 : vector<2x128xf32>
    %16 = tpu.reciprocal %15 : vector<2x128xf32> -> vector<2x128xf32>
    %17 = arith.mulf %12, %16 : vector<2x128xf32>
    %c0_8 = arith.constant 0 : index
    %c0_9 = arith.constant 0 : index
    %18 = vector.load %arg2[%c0_8, %c0_9] : memref<2x256xf32, #tpu.memory_space<vmem>>, vector<2x128xf32>
    tpu.vector_store %arg2[%c0_8, %c0_9], %17 {strides = array<i32>} : memref<2x256xf32, #tpu.memory_space<vmem>>, vector<2x128xf32>,
    %19 = arith.mulf %14, %16 : vector<2x128xf32>
    %c0_10 = arith.constant 0 : index
    %c128_11 = arith.constant 128 : index
    %20 = vector.load %arg2[%c0_10, %c128_11] : memref<2x256xf32, #tpu.memory_space<vmem>>, vector<2x128xf32>
    tpu.vector_store %arg2[%c0_10, %c128_11], %19 {strides = array<i32>} : memref<2x256xf32, #tpu.memory_space<vmem>>, vector<2x128xf32>,
    return
  }
  func.func @transform_0(%arg0: i32) -> (i32, i32) {
    %c0_i32 = arith.constant 0 : i32
    %c0_i32_0 = arith.constant 0 : i32
    return %arg0, %c0_i32 : i32, i32
  }
  func.func @transform_1(%arg0: i32) -> (i32, i32) {
    %c0_i32 = arith.constant 0 : i32
    %c0_i32_0 = arith.constant 0 : i32
    return %arg0, %c0_i32 : i32, i32
  }
}

</mosaic_0001>

<bundles_post_ra>
// kernel: tpu_custom_call.1
= control target key start
LH: loop header
LB: loop body
LE: loop exit
PB: predicated region body
PF: predicated region fallthrough
CT: control target
= control target key end

     0   :  { %6 = vsyncpa [#allocation3], 0  ;;  %s166_s0 = inlined_call_operand.hbm [shape: f32[2,256], index: 0, kind: input, shape index: {}]   ;;  %s167_s1 = inlined_call_operand.hbm [shape: f32[2,256], index: 1, kind: output, shape index: {}]  }
   0x1   :  { %7 = vsyncpa [#allocation4], 0  ;;  %s144_s6 = smov [#allocation2]  }
   0x2   :  { %s14_s7 = sshll.u32 %s144_s6, 4  ;;  %s15_s7 = int_to_ptr.vmem [resolvable:$true] %s14_s7 }
   0x3   :  { %s108_s8 = scalar_lea.vmem %s15_s7, 64  ;;  %p113_p1 = scmp.lt.s32.totalorder %s15_s7, %s15_s7 }
   0x4   :  { %p109_p0 = scmp.ne.s32.totalorder %s15_s7, %s108_s8  ;;  %p114_p2 = scmp.lt.s32.totalorder %s108_s8, %s108_s8 }
   0x6   :  { %p115_p3 = por %p114_p2, %p113_p1 }
   0x8   :  { %p116_p4 = pnand %p115_p3, %p109_p0 }
   0xa   :  { %119 = shalt.err (!%p116_p4)
}
   0xb   :  { %17 = dma.hbm_to_vmem [thread:$0]  %s166_s0, 64, %s15_s7, [#allocation3]  }
   0xc   :  { %140 = dma.done.wait [#allocation3], 64  }
   0xd   :  { %141 = vsyncadd [#allocation3], 4294967232  ;;  %v27_v0 = vlaneseq  ;;  %v145_v1 = vmov 1983009808   ;;  %v22_v6 = vld [vmem:[#allocation2 + $0x2] sm:$0x3] }
   0xe   :  { %v25_v2 = vunpack.c.l.s4 %v145_v1  ;;  %v21_v7 = vld [vmem:[#allocation2] sm:$0x3]  ;;  %s146_s11 = smov 64   ;;  %s147_s12 = smov 96   ;;  %vm48_vm0 = vcmask 261120   ;;  %vm50_vm1 = vcmask 523264  }
   0xf   :  { %v28_v3 = vshrl.u32 %v27_v0, 7  ;;  %s148_s13 = smov 32   ;;  %vm52_vm2 = vcmask 785408   ;;  %s149_s0 = smov [#allocation5]  }
  0x10   :  { %v26_v4 = vunpack.c.0.s8 %v25_v2  ;;  %s79_s14 = sshll.u32 %s149_s0, 4  ;;  %s80_s14 = int_to_ptr.vmem [resolvable:$true] %s79_s14 }
  0x11   :  { %s120_s15 = scalar_lea.vmem %s80_s14, 64  ;;  %p125_p6 = scmp.lt.s32.totalorder %s80_s14, %s80_s14 }
  0x12   :  { %v29_v5 = vsub.s32 %v26_v4, %v28_v3  ;;  %p121_p5 = scmp.ne.s32.totalorder %s80_s14, %s120_s15  ;;  %p126_p7 = scmp.lt.s32.totalorder %s120_s15, %s120_s15 }
  0x14   :  { %v41_v8 = vrot.slane %v22_v6, %v29_v5  ;;  %v30_v9 = vrot.slane %v21_v7, %v29_v5  ;;  %p127_p8 = por %p126_p7, %p125_p6 }
  0x16   :  { %42 = vrot.lane.b32.xlu1 %v41_v8, %s146_s11  ;;  %31 = vrot.lane.b32.xlu0 %v30_v9, %s147_s12  ;;  %p128_p9 = pnand %p127_p8, %p121_p5 }
  0x1a   :  { %45 = vrot.lane.b32.xlu1 %v41_v8, %s148_s13  ;;  %54 = vrot.lane.b32.xlu0 %v30_v9, %s146_s11 }
  0x88   :  { %v43_v10 = vpop.permute.xlu1 %42  ;;  %v32_v11 = vpop.permute.xlu0 %31 }
  0x89   :  { %v49_v12 = vsel %vm48_vm0, %v21_v7, %v32_v11 }
  0x8a   :  { %v51_v16 = vsel %vm50_vm1, %v49_v12, %v43_v10 }
  0x8c   :  { %v46_v13 = vpop.permute.xlu1 %45  ;;  %v55_v14 = vpop.permute.xlu0 %54 }
  0x8d   :  { %v57_v15 = vsel %vm48_vm0, %v32_v11, %v55_v14  ;;  %v53_v18 = vsel %vm52_vm2, %v51_v16, %v46_v13 }
  0x8e   :  { %v58_v17 = vsel %vm50_vm1, %v57_v15, %v46_v13 }
  0x8f   :  { %v59_v19 = vsel %vm52_vm2, %v58_v17, %v22_v6 }
  0x90   :  { %v60_v20 = vmax.f32 %v53_v18, %v59_v19 }
  0x92   :  { %v61_v21 = vsub.f32 %v53_v18, %v60_v20  ;;  %v64_v22 = vsub.f32 %v59_v19, %v60_v20 }
  0x94   :  { %v62_v23 = vmul.f32 1.442695, %v61_v21  ;;  %v65_v24 = vmul.f32 1.442695, %v64_v22 }
  0x96   :  { %94 = vpow2.f32 %v62_v23 }
  0x97   :  { %96 = vpow2.f32 %v65_v24 }
  0xa3   :  { %v95_v25 = vpop.eup %94 }
  0xa4   :  { %v97_v26 = vpop.eup %96 }
  0xa5   :  { %v67_v27 = vadd.f32 %v97_v26, %v95_v25 }
  0xa7   :  { %98 = vrcp.f32 %v67_v27 }
  0xb4   :  { %v99_v28 = vpop.eup %98 }
  0xb5   :  { %v69_v29 = vmul.f32 %v99_v28, %v95_v25  ;;  %v71_v30 = vmul.f32 %v99_v28, %v97_v26 }
  0xb7   :  { %70 = vst [vmem:[#allocation5] sm:$0x3] %v69_v29  ;;  %72 = vst [vmem:[#allocation5 + $0x2] sm:$0x3] %v71_v30 }
  0xb8   :  { %131 = shalt.err (!%p128_p9)
}
  0xb9   :  { %82 = dma.vmem_to_hbm [thread:$0]  %s80_s14, 64, %s167_s1, [#allocation4]  }
  0xba   :  { %142 = dma.done.wait [#allocation4], 64  }
  0xbb   :  { %143 = vsyncadd [#allocation4], 4294967232 }
  0xbc   :  { %86 = vsyncpa [#allocation3], 1 }
  0xbd   :  { %87 = vsyncpa [#allocation4], 1 }

</bundles_post_ra>
